<compile_context>
chip_gen: v5e
topology: v5e:2x2
jax: 0.10.0
libtpu: 0.0.40
codegen_flags: <defaults>
</compile_context>

<pallas_src>
import functools

import jax
import jax.numpy as jnp
from jax.experimental import pallas as pl
from jax.experimental.pallas import tpu as pltpu


def _round_up(x: int, m: int) -> int:
    return ((x + m - 1) // m) * m


def _contrastive_kernel(o1_ref, o2_ref, label_ref, partial_ref, *, margin,
                        batch, block_rows, needs_mask):
    i = pl.program_id(0)

    o1 = o1_ref[...].astype(jnp.float32)                  # (TB, D)
    o2 = o2_ref[...].astype(jnp.float32)                  # (TB, D)
    label = label_ref[...].astype(jnp.float32)            # (TB, 1)

    # F.pairwise_distance adds eps=1e-6 to the difference before the norm.
    diff = o1 - o2 + jnp.float32(1e-6)                    # (TB, D)
    d2 = jnp.sum(diff * diff, axis=-1, keepdims=True)     # (TB, 1)
    d = jnp.sqrt(d2)                                      # euclidean distance

    hinge = jnp.maximum(jnp.float32(margin) - d, 0.0)
    per_pair = (1.0 - label) * d2 + label * (hinge * hinge)   # (TB, 1)

    if needs_mask:
        # Mask rows beyond the true batch (wrapper zero-pads to a tile multiple).
        row = i * block_rows + jax.lax.broadcasted_iota(
            jnp.int32, (block_rows, 1), 0)
        per_pair = jnp.where(row < batch, per_pair, 0.0)

    # Per-block partial sum; final tiny reduction + mean happen in the wrapper.
    partial_ref[...] = jnp.reshape(jnp.sum(per_pair), (1, 1, 1))


def contrastive_loss(output1, output2, label, margin=2.0,
                     target_block_bytes=4 * 1024 * 1024):
    """Pallas TPU implementation of ContrastiveLoss.forward -> scalar f32."""
    assert output1.shape == output2.shape
    B, D = output1.shape
    label = label.reshape(B, 1).astype(jnp.float32)

    # --- tile the batch axis; keep each input block <= ~4 MiB so that
    #     2 inputs x 2 pipeline buffers stays well under the 32 MiB VMEM budget.
    itemsize = jnp.dtype(output1.dtype).itemsize
    row_bytes = max(1, D * itemsize)
    tb = max(8, (target_block_bytes // row_bytes) // 8 * 8)
    tb = min(tb, _round_up(B, 8))          # don't over-pad tiny batches
    b_pad = _round_up(B, tb)
    num_blocks = b_pad // tb
    needs_mask = b_pad != B

    if needs_mask:
        pad = b_pad - B
        output1 = jnp.pad(output1, ((0, pad), (0, 0)))
        output2 = jnp.pad(output2, ((0, pad), (0, 0)))
        label = jnp.pad(label, ((0, pad), (0, 0)))

    kernel = functools.partial(
        _contrastive_kernel, margin=float(margin), batch=B, block_rows=tb,
        needs_mask=needs_mask,
    )

    partials = pl.pallas_call(
        kernel,
        out_shape=jax.ShapeDtypeStruct((num_blocks, 1, 1), jnp.float32),
        grid_spec=pltpu.PrefetchScalarGridSpec(
            num_scalar_prefetch=0,
            grid=(num_blocks,),
            in_specs=[
                pl.BlockSpec((tb, D), lambda i: (i, 0)),
                pl.BlockSpec((tb, D), lambda i: (i, 0)),
                pl.BlockSpec((tb, 1), lambda i: (i, 0)),
            ],
            # Each grid step owns its (1,1,1) partial-sum block -> no
            # cross-step dependence -> the batch axis can be "parallel".
            out_specs=pl.BlockSpec((1, 1, 1), lambda i: (i, 0, 0)),
        ),
        compiler_params=pltpu.CompilerParams(
            dimension_semantics=("parallel",),   # megacore split on v7x
            vmem_limit_bytes=32 * 1024 * 1024,
        ),
    )(output1, output2, label)

    return jnp.sum(partials) / jnp.float32(B)


def _reference_loss(output1, output2, label, margin=2.0):
    # Pure-JAX reference mirroring the PyTorch module.
    d = jnp.sqrt(
        jnp.sum((output1 - output2 + 1e-6) ** 2, axis=-1, keepdims=True)
    )
    label = label.reshape(-1, 1)
    loss = jnp.mean(
        (1.0 - label) * d ** 2
        + label * jnp.maximum(margin - d, 0.0) ** 2
    )
    return loss


if __name__ == "__main__":
    key = jax.random.PRNGKey(0)
    k1, k2, k3 = jax.random.split(key, 3)

    B, D = 8, 32  # small embedding batch, consistent with a Siamese head output
    output1 = jax.random.normal(k1, (B, D), dtype=jnp.float32)
    output2 = jax.random.normal(k2, (B, D), dtype=jnp.float32)
    label = jax.random.bernoulli(k3, p=0.5, shape=(B, 1)).astype(jnp.float32)

    loss = contrastive_loss(output1, output2, label, margin=2.0)
    loss = jax.block_until_ready(loss)

    ref = _reference_loss(output1, output2, label, margin=2.0)
    assert jnp.allclose(loss, ref, rtol=1e-5, atol=1e-5), (loss, ref)

    print("KERNEL_OK")
</pallas_src>

<mosaic_0001>
module attributes {stable_mosaic.version = 11 : i64} {
  func.func @_contrastive_kernel(%arg0: i32, %arg1: memref<8x32xf32, #tpu.memory_space<vmem>>, %arg2: memref<8x32xf32, #tpu.memory_space<vmem>>, %arg3: memref<8x1xf32, #tpu.memory_space<vmem>>, %arg4: memref<1x1x1xf32, #tpu.memory_space<vmem>>) attributes {dimension_semantics = [#tpu.dimension_semantics<parallel>], iteration_bounds = array<i64: 1>, scalar_prefetch = 0 : i64, scratch_operands = 0 : i64, tpu.core_type = #tpu.core_type<tc>, window_params = [{transform_indices = @transform_0, window_bounds = array<i64: 8, 32>}, {transform_indices = @transform_1, window_bounds = array<i64: 8, 32>}, {transform_indices = @transform_2, window_bounds = array<i64: 8, 1>}, {transform_indices = @transform_3, window_bounds = array<i64: 1, 1, 1>}]} {
    %c0 = arith.constant 0 : index
    %c0_0 = arith.constant 0 : index
    %0 = vector.load %arg1[%c0, %c0_0] : memref<8x32xf32, #tpu.memory_space<vmem>>, vector<8x32xf32>
    %c0_1 = arith.constant 0 : index
    %c0_2 = arith.constant 0 : index
    %1 = vector.load %arg2[%c0_1, %c0_2] : memref<8x32xf32, #tpu.memory_space<vmem>>, vector<8x32xf32>
    %c0_3 = arith.constant 0 : index
    %c0_4 = arith.constant 0 : index
    %2 = vector.load %arg3[%c0_3, %c0_4] : memref<8x1xf32, #tpu.memory_space<vmem>>, vector<8x1xf32>
    %3 = arith.subf %0, %1 : vector<8x32xf32>
    %cst = arith.constant 9.99999997E-7 : f32
    %4 = vector.broadcast %cst : f32 to vector<8x32xf32>
    %5 = arith.addf %3, %4 : vector<8x32xf32>
    %6 = arith.mulf %5, %5 : vector<8x32xf32>
    %cst_5 = arith.constant dense<0.000000e+00> : vector<8xf32>
    %7 = vector.multi_reduction <add>, %6, %cst_5 [1] : vector<8x32xf32> to vector<8xf32>
    %8 = vector.shape_cast %7 : vector<8xf32> to vector<8x1xf32>
    %9 = math.sqrt %8 : vector<8x1xf32>
    %cst_6 = arith.constant 2.000000e+00 : f32
    %10 = vector.broadcast %cst_6 : f32 to vector<8x1xf32>
    %11 = arith.subf %10, %9 : vector<8x1xf32>
    %cst_7 = arith.constant 0.000000e+00 : f32
    %12 = vector.broadcast %cst_7 : f32 to vector<8x1xf32>
    %13 = arith.maximumf %11, %12 : vector<8x1xf32>
    %cst_8 = arith.constant 1.000000e+00 : f32
    %14 = vector.broadcast %cst_8 : f32 to vector<8x1xf32>
    %15 = arith.subf %14, %2 : vector<8x1xf32>
    %16 = arith.mulf %15, %8 : vector<8x1xf32>
    %17 = arith.mulf %13, %13 : vector<8x1xf32>
    %18 = arith.mulf %2, %17 : vector<8x1xf32>
    %19 = arith.addf %16, %18 : vector<8x1xf32>
    %20 = vector.shape_cast %19 : vector<8x1xf32> to vector<1x8x1xf32>
    %cst_9 = arith.constant dense<0.000000e+00> : vector<1xf32>
    %21 = vector.multi_reduction <add>, %20, %cst_9 [1, 2] : vector<1x8x1xf32> to vector<1xf32>
    %22 = vector.shape_cast %21 : vector<1xf32> to vector<1x1x1xf32>
    %23 = vector.extract %22[0, 0, 0] : f32 from vector<1x1x1xf32>
    %24 = vector.broadcast %23 : f32 to vector<1x1x1xf32>
    %c0_10 = arith.constant 0 : index
    %c0_11 = arith.constant 0 : index
    %c0_12 = arith.constant 0 : index
    %25 = vector.load %arg4[%c0_10, %c0_11, %c0_12] : memref<1x1x1xf32, #tpu.memory_space<vmem>>, vector<1x1x1xf32>
    tpu.vector_store %arg4[%c0_10, %c0_11, %c0_12], %24 {strides = array<i32>} : memref<1x1x1xf32, #tpu.memory_space<vmem>>, vector<1x1x1xf32>,
    return
  }
  func.func @transform_0(%arg0: i32) -> (i32, i32) {
    %c0_i32 = arith.constant 0 : i32
    %c0_i32_0 = arith.constant 0 : i32
    return %arg0, %c0_i32 : i32, i32
  }
  func.func @transform_1(%arg0: i32) -> (i32, i32) {
    %c0_i32 = arith.constant 0 : i32
    %c0_i32_0 = arith.constant 0 : i32
    return %arg0, %c0_i32 : i32, i32
  }
  func.func @transform_2(%arg0: i32) -> (i32, i32) {
    %c0_i32 = arith.constant 0 : i32
    %c0_i32_0 = arith.constant 0 : i32
    return %arg0, %c0_i32 : i32, i32
  }
  func.func @transform_3(%arg0: i32) -> (i32, i32, i32) {
    %c0_i32 = arith.constant 0 : i32
    %c0_i32_0 = arith.constant 0 : i32
    %c0_i32_1 = arith.constant 0 : i32
    return %arg0, %c0_i32, %c0_i32_0 : i32, i32, i32
  }
}

</mosaic_0001>

<bundles_post_ra>
// kernel: tpu_custom_call.1
= control target key start
LH: loop header
LB: loop body
LE: loop exit
PB: predicated region body
PF: predicated region fallthrough
CT: control target
= control target key end

     0   :  { %8 = vsyncpa [#allocation3], 0  ;;  %s181_s0 = inlined_call_operand.vmem [shape: f32[8,32], index: 0, kind: input, shape index: {}]   ;;  %s182_s1 = inlined_call_operand.hbm [shape: f32[8,32], index: 1, kind: input, shape index: {}]   ;;  %s183_s2 = inlined_call_operand.vmem [shape: f32[8,1], index: 2, kind: input, shape index: {}]   ;;  %s184_s3 = inlined_call_operand.hbm [shape: f32[1,1,1], index: 3, kind: output, shape index: {}]  }
   0x1   :  { %9 = vsyncpa [#allocation4], 0  ;;  %s17_s14 = sshll.u32 %s182_s1, 4  ;;  %s147_s15 = smov [#allocation2]   ;;  %s18_s14 = int_to_ptr.hbm [resolvable:$true] %s17_s14 }
   0x2   :  { %s19_s16 = sshll.u32 %s147_s15, 4  ;;  %s20_s16 = int_to_ptr.vmem [resolvable:$true] %s19_s16 }
   0x3   :  { %22 = dma.hbm_to_vmem [thread:$0]  %s18_s14, 128, %s20_s16, [#allocation3]  }
   0x4   :  { %143 = dma.done.wait [#allocation3], 128  }
   0x5   :  { %144 = vsyncadd [#allocation3], 4294967168  ;;  %v29_v0 = vld [vmem:[%s181_s0] sm:$0xff]  ;;  %vm35_vm0 = vcmask 261120   ;;  %vm58_vm3 = vcmask 7168   ;;  %s79_s22 = sshll.u32 %s184_s3, 4  ;;  %s80_s22 = int_to_ptr.hbm [resolvable:$true] %s79_s22 }
   0x6   :  { %v30_v1 = vld [vmem:[#allocation2] sm:$0xff]  ;;  %vm70_vm4 = vcmask 0  }
   0x7   :  { %v32_v2 = vsub.f32 %v29_v0, %v30_v1  ;;  %v31_v16 = vld [vmem:[%s183_s2] sm:$0xff]  ;;  %s148_s2 = smov [#allocation5]  }
   0x8   :  { %v53_v20 = vsub.f32 1.0, %v31_v16  ;;  %s77_s19 = sshll.u32 %s148_s2, 4  ;;  %s78_s19 = int_to_ptr.vmem [resolvable:$true] %s77_s19 }
   0x9   :  { %v33_v3 = vadd.f32 1e-06, %v32_v2 }
   0xb   :  { %v34_v4 = vmul.f32 %v33_v3, %v33_v3 }
   0xd   :  { %v36_v5 = vsel %vm35_vm0, %v34_v4, 0.0 }
   0xe   :  { %37 = vadd.xlane.f32.xlu0 %v36_v5 }
  0x81   :  { %v38_v6 = vpop.xlane.xlu0 %37 }
  0x82   :  { %93 = vrsqrt.f32 %v38_v6  ;;  %vm46_vm1 = vcmp.eq.f32.partialorder %v38_v6, inf  ;;  %v49_v14 = vand.u32 2147483648, %v38_v6  ;;  %vm48_vm2 = vcmp.eq.f32.partialorder %v38_v6, 0.0 }
  0x83   :  { %v54_v22 = vmul.f32 %v53_v20, %v38_v6 }
  0x88   :  { %v94_v7 = vpop.eup %93 }
  0x89   :  { %v40_v8 = vmul.f32 %v94_v7, %v38_v6 }
  0x8b   :  { %v41_v9 = vmul.f32 %v94_v7, %v40_v8 }
  0x8d   :  { %v42_v10 = vmul.f32 0.5, %v41_v9 }
  0x8f   :  { %v43_v11 = vsub.f32 1.5, %v42_v10 }
  0x91   :  { %v44_v12 = vmul.f32 %v94_v7, %v43_v11 }
  0x93   :  { %v45_v13 = vmul.f32 %v44_v12, %v38_v6 }
  0x95   :  { %v47_v15 = vsel %vm46_vm1, %v38_v6, %v45_v13 }
  0x96   :  { %v50_v17 = vsel %vm48_vm2, %v49_v14, %v47_v15 }
  0x97   :  { %v51_v18 = vsub.f32 2.0, %v50_v17 }
  0x99   :  { %v52_v19 = vmax.f32 %v51_v18, 0.0 }
  0x9b   :  { %v55_v21 = vmul.f32 %v52_v19, %v52_v19 }
  0x9d   :  { %v56_v23 = vmul.f32 %v55_v21, %v31_v16 }
  0x9f   :  { %v57_v24 = vadd.f32 %v56_v23, %v54_v22 }
  0xa1   :  { %v59_v25 = vsel %vm58_vm3, %v57_v24, 0.0 }
  0xa2   :  { %60 = vadd.xlane.f32.xlu0 %v59_v25 }
 0x115   :  { %v61_v26 = vpop.xlane.xlu0 %60 }
 0x116   :  { %v62_v27 = vrot.slane %v61_v26, 4 }
 0x118   :  { %v63_v28 = vadd.f32 %v62_v27, %v61_v26 }
 0x11a   :  { %v64_v29 = vrot.slane %v63_v28, 2 }
 0x11c   :  { %v65_v30 = vadd.f32 %v64_v29, %v63_v28 }
 0x11e   :  { %v66_v31 = vrot.slane %v65_v30, 1 }
 0x120   :  { %v67_v32 = vadd.f32 %v66_v31, %v65_v30 }
 0x122   :  { %89 = vpush %v67_v32 }
 0x153   :  { %s90_s23 = spop %89 }
 0x154   :  { %v69_v33 = vstv %s90_s23 }
 0x155   :  { %71 = vst.msk [vmem:[#allocation5] sm:$0x1] %vm70_vm4, %v69_v33 }
 0x156   :  { %82 = dma.vmem_to_hbm [thread:$0]  %s78_s19, 16, %s80_s22, [#allocation4]  }
 0x157   :  { %145 = dma.done.wait [#allocation4], 16  }
 0x158   :  { %146 = vsyncadd [#allocation4], 4294967280 }
 0x159   :  { %87 = vsyncpa [#allocation3], 1 }
 0x15a   :  { %88 = vsyncpa [#allocation4], 1 }

</bundles_post_ra>
